<compile_context>
chip_gen: v5e
topology: v5e:2x2
jax: 0.10.0
libtpu: 0.0.40
codegen_flags: <defaults>
</compile_context>

<pallas_src>
import numpy as np
import jax
import jax.numpy as jnp
from jax.experimental import pallas as pl
from jax.experimental.pallas import tpu as pltpu


def _round_up(x, m):
    return (x + m - 1) // m * m


def _make_kernel(C_in, KH, KW, Wp, L):
    tap_offsets = [kh * Wp + kw for kh in range(KH) for kw in range(KW)]

    def kernel(x_ref, w_ref, b_ref, o_ref):
        # x_ref: (C_in, Wflat)        channel-major flat padded input
        # w_ref: (C_out, KH*KW*C_in)  scale-folded weight, tap-major (kh,kw,c)
        # b_ref: (C_out, 1)
        # o_ref: (C_out, L)           lane-dense flat output
        acc = None
        for t, off in enumerate(tap_offsets):            # static unrolled, 9 taps
            w_tap = w_ref[:, t * C_in:(t + 1) * C_in]     # (C_out, C_in)
            x_tap = x_ref[:, off:off + L]                 # (C_in, L) lane slice
            d = jnp.dot(w_tap, x_tap, preferred_element_type=jnp.float32)
            acc = d if acc is None else acc + d
        o_ref[...] = (acc + b_ref[...]).astype(o_ref.dtype)

    return kernel


def equalized_conv2d(x, weight, bias, *, stride=1, padding=0, groups=1,
                     padding_mode="reflect"):
    """x: (N, C_in, H, W); weight: (C_out, C_in, KH, KW); bias: (C_out,)."""
    assert stride == 1, "only stride=1 implemented"
    assert groups == 1, "only groups=1 implemented"

    N, C_in, H, W = x.shape
    C_out, C_in_w, KH, KW = weight.shape
    assert C_in_w == C_in
    if padding_mode == "reflect":
        assert padding <= H - 1 and padding <= W - 1, "reflect pad too large"

    scale = float(np.sqrt(2.0) / np.sqrt(KH * KW * C_in))

    if padding > 0:
        mode = "reflect" if padding_mode == "reflect" else "constant"
        x_pad = jnp.pad(
            x, ((0, 0), (0, 0), (padding, padding), (padding, padding)),
            mode=mode)
    else:
        x_pad = x

    Hp, Wp = H + 2 * padding, W + 2 * padding
    H_out, W_out = Hp - KH + 1, Wp - KW + 1

    # Flat "conv over the padded grid" coordinates: q = n*Hp*Wp + h*Wp + w.
    flat_valid = N * Hp * Wp
    q_max = (N - 1) * Hp * Wp + (H_out - 1) * Wp + (W_out - 1)
    L = _round_up(q_max + 1, 128)            # lane-dense output width (640 here)
    max_off = (KH - 1) * Wp + (KW - 1)       # largest tap offset (38 here)
    Wflat = _round_up(L + max_off, 128)      # lane-padded input width (768 here)

    # --- wrapper-side layout plumbing (tiny, un-inflated tensors) -----------
    x_flat = x_pad.astype(jnp.float32).transpose(1, 0, 2, 3).reshape(
        C_in, flat_valid)
    x_flat = jnp.pad(x_flat, ((0, 0), (0, Wflat - flat_valid)))

    # Fold the equalized-LR scale into the weight (conv is linear) and flatten
    # tap-major ((kh, kw) outer, c_in inner) to match the kernel's tap slices.
    w_flat = (weight.astype(jnp.float32) * scale).transpose(0, 2, 3, 1).reshape(
        C_out, KH * KW * C_in)
    bias2d = bias.reshape(C_out, 1).astype(jnp.float32)

    out_flat = pl.pallas_call(
        _make_kernel(C_in, KH, KW, Wp, L),
        out_shape=jax.ShapeDtypeStruct((C_out, L), jnp.float32),
        in_specs=[
            pl.BlockSpec(memory_space=pltpu.MemorySpace.VMEM),
            pl.BlockSpec(memory_space=pltpu.MemorySpace.VMEM),
            pl.BlockSpec(memory_space=pltpu.MemorySpace.VMEM),
        ],
        out_specs=pl.BlockSpec(memory_space=pltpu.MemorySpace.VMEM),
    )(x_flat, w_flat, bias2d)

    # Recover NCHW: valid outputs sit at q = n*Hp*Wp + h*Wp + w with h < H_out,
    # w < W_out.  (Kept NCHW to match the PyTorch module; a multi-layer network
    # would keep the lane-dense flat layout between layers instead.)
    if L < flat_valid:
        out_flat = jnp.pad(out_flat, ((0, 0), (0, flat_valid - L)))
    out = out_flat[:, :flat_valid].reshape(C_out, N, Hp, Wp)
    out = out[:, :, :H_out, :W_out].transpose(1, 0, 2, 3)
    return out.astype(x.dtype)


if __name__ == "__main__":
    # Module config: EqualizedConv2d(in_planes=4, out_planes=8, kernel_size=3,
    #                                stride=1, padding=1, padding_mode='reflect')
    N, C_in, H, W = 2, 4, 16, 16
    C_out, K = 8, 3
    padding = 1

    key = jax.random.PRNGKey(0)
    kx, kw, kb = jax.random.split(key, 3)
    x = jax.random.normal(kx, (N, C_in, H, W), dtype=jnp.float32)
    weight = jax.random.normal(kw, (C_out, C_in, K, K), dtype=jnp.float32)  # nn.init.normal_
    bias = jax.random.normal(kb, (C_out,), dtype=jnp.float32)               # nn.init.normal_

    fwd = jax.jit(lambda x_, w_, b_: equalized_conv2d(
        x_, w_, b_, stride=1, padding=padding, groups=1,
        padding_mode="reflect"))
    y = jax.block_until_ready(fwd(x, weight, bias))

    # Reference check with XLA conv (same math).
    scale = float(np.sqrt(2.0) / np.sqrt(K * K * C_in))
    x_pad = jnp.pad(x, ((0, 0), (0, 0), (padding, padding), (padding, padding)),
                    mode="reflect")
    ref = jax.lax.conv_general_dilated(
        x_pad * scale, weight, window_strides=(1, 1), padding="VALID",
        dimension_numbers=("NCHW", "OIHW", "NCHW"),
    ) + bias.reshape(1, C_out, 1, 1)
    ref = jax.block_until_ready(ref)

    assert y.shape == (N, C_out, H, W), y.shape
    np.testing.assert_allclose(np.asarray(y), np.asarray(ref),
                               rtol=1e-5, atol=1e-5)
    print("KERNEL_OK")
</pallas_src>

<mosaic_0001>
module attributes {stable_mosaic.version = 11 : i64} {
  func.func @kernel(%arg0: memref<4x768xf32, #tpu.memory_space<vmem>>, %arg1: memref<8x36xf32, #tpu.memory_space<vmem>>, %arg2: memref<8x1xf32, #tpu.memory_space<vmem>>, %arg3: memref<8x640xf32, #tpu.memory_space<vmem>>) attributes {dimension_semantics = [], scalar_prefetch = 0 : i64, scratch_operands = 0 : i64, tpu.core_type = #tpu.core_type<tc>} {
    %c0 = arith.constant 0 : index
    %c0_0 = arith.constant 0 : index
    %0 = vector.load %arg1[%c0, %c0_0] : memref<8x36xf32, #tpu.memory_space<vmem>>, vector<8x4xf32>
    %c0_1 = arith.constant 0 : index
    %c0_2 = arith.constant 0 : index
    %1 = vector.load %arg0[%c0_1, %c0_2] : memref<4x768xf32, #tpu.memory_space<vmem>>, vector<4x640xf32>
    %cst = arith.constant dense<0.000000e+00> : vector<8x640xf32>
    %2 = tpu.matmul %0, %1, %cst {dimension_numbers = #tpu.dot_dimension_numbers<[1], [0], [0], [1], [0, 0, 1, 1], [], []>} : vector<8x4xf32>, vector<4x640xf32>, vector<8x640xf32> -> vector<8x640xf32>
    %c0_3 = arith.constant 0 : index
    %c4 = arith.constant 4 : index
    %3 = vector.load %arg1[%c0_3, %c4] : memref<8x36xf32, #tpu.memory_space<vmem>>, vector<8x4xf32>
    %c0_4 = arith.constant 0 : index
    %c1 = arith.constant 1 : index
    %4 = vector.load %arg0[%c0_4, %c1] : memref<4x768xf32, #tpu.memory_space<vmem>>, vector<4x640xf32>
    %cst_5 = arith.constant dense<0.000000e+00> : vector<8x640xf32>
    %5 = tpu.matmul %3, %4, %cst_5 {dimension_numbers = #tpu.dot_dimension_numbers<[1], [0], [0], [1], [0, 0, 1, 1], [], []>} : vector<8x4xf32>, vector<4x640xf32>, vector<8x640xf32> -> vector<8x640xf32>
    %6 = arith.addf %2, %5 : vector<8x640xf32>
    %c0_6 = arith.constant 0 : index
    %c8 = arith.constant 8 : index
    %7 = vector.load %arg1[%c0_6, %c8] : memref<8x36xf32, #tpu.memory_space<vmem>>, vector<8x4xf32>
    %c0_7 = arith.constant 0 : index
    %c2 = arith.constant 2 : index
    %8 = vector.load %arg0[%c0_7, %c2] : memref<4x768xf32, #tpu.memory_space<vmem>>, vector<4x640xf32>
    %cst_8 = arith.constant dense<0.000000e+00> : vector<8x640xf32>
    %9 = tpu.matmul %7, %8, %cst_8 {dimension_numbers = #tpu.dot_dimension_numbers<[1], [0], [0], [1], [0, 0, 1, 1], [], []>} : vector<8x4xf32>, vector<4x640xf32>, vector<8x640xf32> -> vector<8x640xf32>
    %10 = arith.addf %6, %9 : vector<8x640xf32>
    %c0_9 = arith.constant 0 : index
    %c12 = arith.constant 12 : index
    %11 = vector.load %arg1[%c0_9, %c12] : memref<8x36xf32, #tpu.memory_space<vmem>>, vector<8x4xf32>
    %c0_10 = arith.constant 0 : index
    %c18 = arith.constant 18 : index
    %12 = vector.load %arg0[%c0_10, %c18] : memref<4x768xf32, #tpu.memory_space<vmem>>, vector<4x640xf32>
    %cst_11 = arith.constant dense<0.000000e+00> : vector<8x640xf32>
    %13 = tpu.matmul %11, %12, %cst_11 {dimension_numbers = #tpu.dot_dimension_numbers<[1], [0], [0], [1], [0, 0, 1, 1], [], []>} : vector<8x4xf32>, vector<4x640xf32>, vector<8x640xf32> -> vector<8x640xf32>
    %14 = arith.addf %10, %13 : vector<8x640xf32>
    %c0_12 = arith.constant 0 : index
    %c16 = arith.constant 16 : index
    %15 = vector.load %arg1[%c0_12, %c16] : memref<8x36xf32, #tpu.memory_space<vmem>>, vector<8x4xf32>
    %c0_13 = arith.constant 0 : index
    %c19 = arith.constant 19 : index
    %16 = vector.load %arg0[%c0_13, %c19] : memref<4x768xf32, #tpu.memory_space<vmem>>, vector<4x640xf32>
    %cst_14 = arith.constant dense<0.000000e+00> : vector<8x640xf32>
    %17 = tpu.matmul %15, %16, %cst_14 {dimension_numbers = #tpu.dot_dimension_numbers<[1], [0], [0], [1], [0, 0, 1, 1], [], []>} : vector<8x4xf32>, vector<4x640xf32>, vector<8x640xf32> -> vector<8x640xf32>
    %18 = arith.addf %14, %17 : vector<8x640xf32>
    %c0_15 = arith.constant 0 : index
    %c20 = arith.constant 20 : index
    %19 = vector.load %arg1[%c0_15, %c20] : memref<8x36xf32, #tpu.memory_space<vmem>>, vector<8x4xf32>
    %c0_16 = arith.constant 0 : index
    %c20_17 = arith.constant 20 : index
    %20 = vector.load %arg0[%c0_16, %c20_17] : memref<4x768xf32, #tpu.memory_space<vmem>>, vector<4x640xf32>
    %cst_18 = arith.constant dense<0.000000e+00> : vector<8x640xf32>
    %21 = tpu.matmul %19, %20, %cst_18 {dimension_numbers = #tpu.dot_dimension_numbers<[1], [0], [0], [1], [0, 0, 1, 1], [], []>} : vector<8x4xf32>, vector<4x640xf32>, vector<8x640xf32> -> vector<8x640xf32>
    %22 = arith.addf %18, %21 : vector<8x640xf32>
    %c0_19 = arith.constant 0 : index
    %c24 = arith.constant 24 : index
    %23 = vector.load %arg1[%c0_19, %c24] : memref<8x36xf32, #tpu.memory_space<vmem>>, vector<8x4xf32>
    %c0_20 = arith.constant 0 : index
    %c36 = arith.constant 36 : index
    %24 = vector.load %arg0[%c0_20, %c36] : memref<4x768xf32, #tpu.memory_space<vmem>>, vector<4x640xf32>
    %cst_21 = arith.constant dense<0.000000e+00> : vector<8x640xf32>
    %25 = tpu.matmul %23, %24, %cst_21 {dimension_numbers = #tpu.dot_dimension_numbers<[1], [0], [0], [1], [0, 0, 1, 1], [], []>} : vector<8x4xf32>, vector<4x640xf32>, vector<8x640xf32> -> vector<8x640xf32>
    %26 = arith.addf %22, %25 : vector<8x640xf32>
    %c0_22 = arith.constant 0 : index
    %c28 = arith.constant 28 : index
    %27 = vector.load %arg1[%c0_22, %c28] : memref<8x36xf32, #tpu.memory_space<vmem>>, vector<8x4xf32>
    %c0_23 = arith.constant 0 : index
    %c37 = arith.constant 37 : index
    %28 = vector.load %arg0[%c0_23, %c37] : memref<4x768xf32, #tpu.memory_space<vmem>>, vector<4x640xf32>
    %cst_24 = arith.constant dense<0.000000e+00> : vector<8x640xf32>
    %29 = tpu.matmul %27, %28, %cst_24 {dimension_numbers = #tpu.dot_dimension_numbers<[1], [0], [0], [1], [0, 0, 1, 1], [], []>} : vector<8x4xf32>, vector<4x640xf32>, vector<8x640xf32> -> vector<8x640xf32>
    %30 = arith.addf %26, %29 : vector<8x640xf32>
    %c0_25 = arith.constant 0 : index
    %c32 = arith.constant 32 : index
    %31 = vector.load %arg1[%c0_25, %c32] : memref<8x36xf32, #tpu.memory_space<vmem>>, vector<8x4xf32>
    %c0_26 = arith.constant 0 : index
    %c38 = arith.constant 38 : index
    %32 = vector.load %arg0[%c0_26, %c38] : memref<4x768xf32, #tpu.memory_space<vmem>>, vector<4x640xf32>
    %cst_27 = arith.constant dense<0.000000e+00> : vector<8x640xf32>
    %33 = tpu.matmul %31, %32, %cst_27 {dimension_numbers = #tpu.dot_dimension_numbers<[1], [0], [0], [1], [0, 0, 1, 1], [], []>} : vector<8x4xf32>, vector<4x640xf32>, vector<8x640xf32> -> vector<8x640xf32>
    %34 = arith.addf %30, %33 : vector<8x640xf32>
    %c0_28 = arith.constant 0 : index
    %c0_29 = arith.constant 0 : index
    %35 = vector.load %arg2[%c0_28, %c0_29] : memref<8x1xf32, #tpu.memory_space<vmem>>, vector<8x1xf32>
    %36 = vector.broadcast %35 : vector<8x1xf32> to vector<8x640xf32>
    %37 = arith.addf %34, %36 : vector<8x640xf32>
    %c0_30 = arith.constant 0 : index
    %c0_31 = arith.constant 0 : index
    %38 = vector.load %arg3[%c0_30, %c0_31] : memref<8x640xf32, #tpu.memory_space<vmem>>, vector<8x640xf32>
    tpu.vector_store %arg3[%c0_30, %c0_31], %37 {strides = array<i32>} : memref<8x640xf32, #tpu.memory_space<vmem>>, vector<8x640xf32>,
    return
  }
}

</mosaic_0001>

<bundles_post_ra>
// kernel: _lambda_.1
= control target key start
LH: loop header
LB: loop body
LE: loop exit
PB: predicated region body
PF: predicated region fallthrough
CT: control target
= control target key end

     0   :  { %s1515_s18 = smov 124   ;;  %s1516_s22 = smov 127   ;;  %vm50_vm0 = vcmask 1039360   ;;  %vm59_vm1 = vcmask 1043456   ;;  %vm56_vm2 = vcmask 31744   ;;  %vm328_vm3 = vcmask 1031168   ;;  %s1799_s1 = inlined_call_operand.vmem [shape: f32[8,36], index: 1, kind: input, shape index: {}]   ;;  %s1800_s0 = inlined_call_operand.vmem [shape: f32[4,768], index: 0, kind: input, shape index: {}]   ;;  %s1801_s2 = inlined_call_operand.vmem [shape: f32[8,1], index: 2, kind: input, shape index: {}]   ;;  %s1802_s3 = inlined_call_operand.vmem [shape: f32[8,640], index: 3, kind: output, shape index: {}]  }
   0x1   :  { %v1554_v0 = vld [vmem:[%s1799_s1] sm:$0xff]  ;;  %v1559_v1 = vld [vmem:[%s1800_s0 + $0x8] sm:$0xff]  ;;  %v1571_v3 = vld [vmem:[%s1800_s0 + $0x10] sm:$0xff]  ;;  %s1517_s23 = smov 120   ;;  %s1519_s24 = smov 116   ;;  %vm484_vm4 = vcmask 900096  }
   0x2   :  { %v1564_v2 = vld [vmem:[%s1800_s0] sm:$0xff]  ;;  %22 = vrot.lane.b32.xlu1 %v1554_v0, %s1515_s18  ;;  %29 = vst [vmem:[#allocation1 + $0x10] ss:$2 sm:$0xff] %v1559_v1  ;;  %v17_v4 = vld [vmem:[%s1800_s0 + $0x10] sm:$0xf]  ;;  %s1518_s0 = smov 126  }
   0x3   :  { %27 = vst [vmem:[#allocation1] ss:$2 sm:$0xff] %v1564_v2  ;;  %s1520_s25 = smov 110   ;;  %s1521_s26 = smov 109   ;;  %vm640_vm5 = vcmask 891904   ;;  %vm796_vm6 = vcmask 883712  }
   0x4   :  { %31 = vst [vmem:[#allocation1 + $0x20] ss:$2 sm:$0xff] %v1571_v3  ;;  %s1522_s27 = smov 112   ;;  %s1523_s28 = smov 108   ;;  %vm952_vm7 = vcmask 752640   ;;  %vm1108_vm8 = vcmask 744448  }
   0x5   :  { %s1524_s29 = smov 92   ;;  %s1525_s30 = smov 104   ;;  %vm1264_vm9 = vcmask 736256  }
   0x6   :  { %s1526_s4 = smov 91   ;;  %s1527_s5 = smov 100  }
   0x7   :  { %s1528_s6 = smov 90   ;;  %s1529_s7 = smov 96  }
   0x9   :  { %v34_v5 = vld.sshfl [vmem:[#allocation1 + $0x10] sm:$0xff pattern:$0x75316420]  ;;  %v35_v6 = vld.sshfl [vmem:[#allocation1 + $0x18] sm:$0xff pattern:$0x75316420] }
   0xa   :  { %42 = vrot.lane.b32.xlu1 %v34_v5, %s1516_s22  ;;  %v32_v7 = vld.sshfl [vmem:[#allocation1] sm:$0xff pattern:$0x75316420]  ;;  %v33_v8 = vld.sshfl [vmem:[#allocation1 + $0x8] sm:$0xff pattern:$0x75316420]  ;;  %44 = vrot.lane.b32.xlu2 %v35_v6, %s1516_s22 }
   0xb   :  { %38 = vrot.lane.b32.xlu0 %v32_v7, %s1516_s22  ;;  %173 = vst [vmem:[#allocation1] ss:$2 sm:$0xff] %v1564_v2  ;;  %v37_v9 = vld.sshfl [vmem:[#allocation1 + $0x28] sm:$0xff pattern:$0x75316420] }
   0xc   :  { %175 = vst [vmem:[#allocation1 + $0x10] ss:$2 sm:$0xff] %v1559_v1  ;;  %v36_v10 = vld.sshfl [vmem:[#allocation1 + $0x20] sm:$0xff pattern:$0x75316420] }
   0xd   :  { %177 = vst [vmem:[#allocation1 + $0x20] ss:$2 sm:$0xff] %v17_v4 }
  0x12   :  { %300 = vrot.lane.b32.xlu1 %v1554_v0, %s1517_s23  ;;  %v1581_v11 = vld.sshfl [vmem:[#allocation1] sm:$0xff pattern:$0x75316420]  ;;  %v1583_v12 = vld.sshfl [vmem:[#allocation1 + $0x8] sm:$0xff pattern:$0x75316420]  ;;  %46 = vrot.lane.b32.xlu2 %v36_v10, %s1516_s22 }
  0x13   :  { %40 = vrot.lane.b32.xlu0 %v33_v8, %s1516_s22  ;;  %305 = vst [vmem:[#allocation1] ss:$2 sm:$0xff] %v1564_v2  ;;  %v1586_v13 = vld.sshfl [vmem:[#allocation1 + $0x10] sm:$0xff pattern:$0x75316420] }
  0x14   :  { %v1588_v14 = vld.sshfl [vmem:[#allocation1 + $0x18] sm:$0xff pattern:$0x75316420]  ;;  %v1590_v15 = vld.sshfl [vmem:[#allocation1 + $0x20] sm:$0xff pattern:$0x75316420] }
  0x15   :  { %307 = vst [vmem:[#allocation1 + $0x10] ss:$2 sm:$0xff] %v1559_v1 }
  0x16   :  { %309 = vst [vmem:[#allocation1 + $0x20] ss:$2 sm:$0xff] %v1571_v3 }
  0x1a   :  { %v310_v16 = vld.sshfl [vmem:[#allocation1] sm:$0xff pattern:$0x75316420]  ;;  %v311_v17 = vld.sshfl [vmem:[#allocation1 + $0x8] sm:$0xff pattern:$0x75316420] }
  0x1b   :  { %48 = vrot.lane.b32.xlu0 %v37_v9, %s1516_s22  ;;  %316 = vrot.lane.b32.xlu1 %v310_v16, %s1518_s0  ;;  %461 = vst [vmem:[#allocation1] ss:$2 sm:$0xff] %v1564_v2 }
  0x1c   :  { %318 = vrot.lane.b32.xlu2 %v311_v17, %s1518_s0  ;;  %v313_v18 = vld.sshfl [vmem:[#allocation1 + $0x18] sm:$0xff pattern:$0x75316420]  ;;  %v312_v21 = vld.sshfl [vmem:[#allocation1 + $0x10] sm:$0xff pattern:$0x75316420] }
  0x1d   :  { %v315_v19 = vld.sshfl [vmem:[#allocation1 + $0x28] sm:$0xff pattern:$0x75316420]  ;;  %v314_v20 = vld.sshfl [vmem:[#allocation1 + $0x20] sm:$0xff pattern:$0x75316420] }
  0x1e   :  { %465 = vst [vmem:[#allocation1 + $0x20] ss:$2 sm:$0xff] %v1571_v3 }
  0x1f   :  { %463 = vst [vmem:[#allocation1 + $0x10] ss:$2 sm:$0xff] %v1559_v1 }
  0x22   :  { %v467_v22 = vld.sshfl [vmem:[#allocation1 + $0x8] sm:$0xff pattern:$0x75316420]  ;;  %v466_v23 = vld.sshfl [vmem:[#allocation1] sm:$0xff pattern:$0x75316420] }
  0x23   :  { %320 = vrot.lane.b32.xlu0 %v312_v21, %s1518_s0  ;;  %326 = vrot.lane.b32.xlu1 %v315_v19, %s1518_s0  ;;  %617 = vst [vmem:[#allocation1] ss:$2 sm:$0xff] %v1564_v2 }
  0x24   :  { %322 = vrot.lane.b32.xlu2 %v313_v18, %s1518_s0 }
  0x25   :  { %v471_v24 = vld.sshfl [vmem:[#allocation1 + $0x28] sm:$0xff pattern:$0x75316420]  ;;  %v470_v27 = vld.sshfl [vmem:[#allocation1 + $0x20] sm:$0xff pattern:$0x75316420] }
  0x26   :  { %v469_v25 = vld.sshfl [vmem:[#allocation1 + $0x18] sm:$0xff pattern:$0x75316420]  ;;  %v468_v26 = vld.sshfl [vmem:[#allocation1 + $0x10] sm:$0xff pattern:$0x75316420] }
  0x27   :  { %619 = vst [vmem:[#allocation1 + $0x10] ss:$2 sm:$0xff] %v1559_v1 }
  0x28   :  { %621 = vst [vmem:[#allocation1 + $0x20] ss:$2 sm:$0xff] %v1571_v3 }
  0x2a   :  { %v623_v28 = vld.sshfl [vmem:[#allocation1 + $0x8] sm:$0xff pattern:$0x75316420]  ;;  %v622_v29 = vld.sshfl [vmem:[#allocation1] sm:$0xff pattern:$0x75316420] }
  0x2b   :  { %324 = vrot.lane.b32.xlu0 %v314_v20, %s1518_s0  ;;  %456 = vrot.lane.b32.xlu1 %v1554_v0, %s1519_s24  ;;  %773 = vst [vmem:[#allocation1] ss:$2 sm:$0xff] %v1564_v2 }
  0x2c   :  { %472 = vrot.lane.b32.xlu2 %v466_v23, %s1520_s25 }
  0x2e   :  { %v625_v30 = vld.sshfl [vmem:[#allocation1 + $0x18] sm:$0xff pattern:$0x75316420]  ;;  %v624_v31 = vld.sshfl [vmem:[#allocation1 + $0x10] sm:$0xff pattern:$0x75316420] }
  0x2f   :  { %775 = vst [vmem:[#allocation1 + $0x10] ss:$2 sm:$0xff] %v1559_v1  ;;  %v627_v32 = vld.sshfl [vmem:[#allocation1 + $0x28] sm:$0xff pattern:$0x75316420] }
  0x30   :  { %v626_v35 = vld.sshfl [vmem:[#allocation1 + $0x20] sm:$0xff pattern:$0x75316420] }
  0x31   :  { %777 = vst [vmem:[#allocation1 + $0x20] ss:$2 sm:$0xff] %v1571_v3 }
  0x32   :  { %v779_v33 = vld.sshfl [vmem:[#allocation1 + $0x8] sm:$0xff pattern:$0x75316420]  ;;  %v778_v34 = vld.sshfl [vmem:[#allocation1] sm:$0xff pattern:$0x75316420] }
  0x33   :  { %480 = vrot.lane.b32.xlu1 %v470_v27, %s1520_s25  ;;  %474 = vrot.lane.b32.xlu0 %v467_v22, %s1520_s25  ;;  %929 = vst [vmem:[#allocation1] ss:$2 sm:$0xff] %v1564_v2 }
  0x34   :  { %476 = vrot.lane.b32.xlu2 %v468_v26, %s1520_s25 }
  0x36   :  { %v781_v36 = vld.sshfl [vmem:[#allocation1 + $0x18] sm:$0xff pattern:$0x75316420]  ;;  %v780_v37 = vld.sshfl [vmem:[#allocation1 + $0x10] sm:$0xff pattern:$0x75316420] }
  0x37   :  { %931 = vst [vmem:[#allocation1 + $0x10] ss:$2 sm:$0xff] %v1559_v1 }
  0x38   :  { %v782_v38 = vld.sshfl [vmem:[#allocation1 + $0x20] sm:$0xff pattern:$0x75316420]  ;;  %v783_v39 = vld.sshfl [vmem:[#allocation1 + $0x28] sm:$0xff pattern:$0x75316420] }
  0x39   :  { %933 = vst [vmem:[#allocation1 + $0x20] ss:$2 sm:$0xff] %v1571_v3 }
  0x3a   :  { %v934_v40 = vld.sshfl [vmem:[#allocation1] sm:$0xff pattern:$0x75316420]  ;;  %v935_v42 = vld.sshfl [vmem:[#allocation1 + $0x8] sm:$0xff pattern:$0x75316420] }
  0x3b   :  { %478 = vrot.lane.b32.xlu0 %v469_v25, %s1520_s25  ;;  %630 = vrot.lane.b32.xlu1 %v623_v28, %s1521_s26  ;;  %1085 = vst [vmem:[#allocation1] ss:$2 sm:$0xff] %v1564_v2 }
  0x3c   :  { %482 = vrot.lane.b32.xlu2 %v471_v24, %s1520_s25 }
  0x3e   :  { %v936_v41 = vld.sshfl [vmem:[#allocation1 + $0x10] sm:$0xff pattern:$0x75316420]  ;;  %v937_v43 = vld.sshfl [vmem:[#allocation1 + $0x18] sm:$0xff pattern:$0x75316420] }
  0x3f   :  { %1087 = vst [vmem:[#allocation1 + $0x10] ss:$2 sm:$0xff] %v1559_v1 }
  0x40   :  { %v938_v46 = vld.sshfl [vmem:[#allocation1 + $0x20] sm:$0xff pattern:$0x75316420]  ;;  %v939_v48 = vld.sshfl [vmem:[#allocation1 + $0x28] sm:$0xff pattern:$0x75316420] }
  0x41   :  { %1089 = vst [vmem:[#allocation1 + $0x20] ss:$2 sm:$0xff] %v1571_v3 }
  0x42   :  { %v1091_v44 = vld.sshfl [vmem:[#allocation1 + $0x8] sm:$0xff pattern:$0x75316420]  ;;  %v1090_v45 = vld.sshfl [vmem:[#allocation1] sm:$0xff pattern:$0x75316420] }
  0x43   :  { %634 = vrot.lane.b32.xlu1 %v625_v30, %s1521_s26  ;;  %628 = vrot.lane.b32.xlu0 %v622_v29, %s1521_s26  ;;  %1241 = vst [vmem:[#allocation1] ss:$2 sm:$0xff] %v1564_v2 }
  0x44   :  { %612 = vrot.lane.b32.xlu2 %v1554_v0, %s1522_s27 }
  0x46   :  { %v1093_v47 = vld.sshfl [vmem:[#allocation1 + $0x18] sm:$0xff pattern:$0x75316420]  ;;  %v1092_v49 = vld.sshfl [vmem:[#allocation1 + $0x10] sm:$0xff pattern:$0x75316420] }
  0x47   :  { %1243 = vst [vmem:[#allocation1 + $0x10] ss:$2 sm:$0xff] %v1559_v1 }
  0x48   :  { %v1095_v53 = vld.sshfl [vmem:[#allocation1 + $0x28] sm:$0xff pattern:$0x75316420]  ;;  %v1094_v54 = vld.sshfl [vmem:[#allocation1 + $0x20] sm:$0xff pattern:$0x75316420] }
  0x49   :  { %1245 = vst [vmem:[#allocation1 + $0x20] ss:$2 sm:$0xff] %v1571_v3 }
  0x4a   :  { %v1246_v61 = vld.sshfl [vmem:[#allocation1] sm:$0xff pattern:$0x75316420]  ;;  %v1247_v5 = vld.sshfl [vmem:[#allocation1 + $0x8] sm:$0xff pattern:$0x75316420] }
  0x4b   :  { %632 = vrot.lane.b32.xlu0 %v624_v31, %s1521_s26  ;;  %786 = vrot.lane.b32.xlu1 %v779_v33, %s1523_s28 }
  0x4c   :  { %636 = vrot.lane.b32.xlu2 %v626_v35, %s1521_s26 }
  0x4e   :  { %v1248_v4 = vld.sshfl [vmem:[#allocation1 + $0x10] sm:$0xff pattern:$0x75316420] }
  0x53   :  { %638 = vrot.lane.b32.xlu0 %v627_v32, %s1521_s26  ;;  %768 = vrot.lane.b32.xlu1 %v1554_v0, %s1523_s28 }
  0x54   :  { %788 = vrot.lane.b32.xlu2 %v780_v37, %s1523_s28 }
  0x5b   :  { %790 = vrot.lane.b32.xlu0 %v781_v36, %s1523_s28  ;;  %940 = vrot.lane.b32.xlu1 %v934_v40, %s1524_s29 }
  0x5c   :  { %784 = vrot.lane.b32.xlu2 %v778_v34, %s1523_s28 }
  0x63   :  { %792 = vrot.lane.b32.xlu0 %v782_v38, %s1523_s28  ;;  %924 = vrot.lane.b32.xlu1 %v1554_v0, %s1525_s30 }
  0x64   :  { %v45_v50 = vpop.permute.xlu2 %44  ;;  %942 = vrot.lane.b32.xlu2 %v935_v42, %s1524_s29 }
  0x6b   :  { %944 = vrot.lane.b32.xlu0 %v936_v41, %s1524_s29  ;;  %948 = vrot.lane.b32.xlu1 %v938_v46, %s1524_s29 }
  0x6c   :  { %v47_v51 = vpop.permute.xlu2 %46  ;;  %794 = vrot.lane.b32.xlu2 %v783_v39, %s1523_s28 }
  0x6d   :  { %v54_v52 = vsel %vm50_vm0, %v45_v50, %v47_v51 }
  0x6e   :  { %1413 = vmatpush.msk.msra.mxu3 %vm59_vm1, %v54_v52 }
  0x70   :  { %1421 = vmatpush.msk.msrb.mxu3 %vm59_vm1, %v1586_v13 }
  0x73   :  { %946 = vrot.lane.b32.xlu0 %v937_v43, %s1524_s29  ;;  %1098 = vrot.lane.b32.xlu1 %v1091_v44, %s1526_s4 }
  0x74   :  { %v23_v55 = vpop.permute.xlu1 %22  ;;  %950 = vrot.lane.b32.xlu2 %v939_v48, %s1524_s29 }
  0x75   :  { %1414 = vmatmul.msk.f32.vlgmr.msra.gmra.mxu3 %vm56_vm2, %v23_v55 }
  0x76   :  { %v319_v56 = vpop.permute.xlu2 %318 }
  0x7b   :  { %1102 = vrot.lane.b32.xlu1 %v1093_v47, %s1526_s4  ;;  %1096 = vrot.lane.b32.xlu0 %v1090_v45, %s1526_s4 }
  0x7c   :  { %v43_v57 = vpop.permute.xlu1 %42  ;;  %1080 = vrot.lane.b32.xlu2 %v1554_v0, %s1527_s5 }
  0x7d   :  { %v39_v58 = vpop.permute.xlu0 %38  ;;  %v53_v59 = vsel %vm50_vm0, %v43_v57, %v45_v50  ;;  %1422 = vmatmul.msk.f32.vlgmr.msrb.gmra.mxu3 %vm56_vm2, %v1554_v0 }
  0x7e   :  { %1411 = vmatpush.msk.msra.mxu2 %vm59_vm1, %v53_v59  ;;  %v323_v60 = vpop.permute.xlu2 %322 }
  0x7f   :  { %1412 = vmatmul.msk.f32.vlgmr.msra.gmra.mxu2 %vm56_vm2, %v23_v55 }
  0x80   :  { %1419 = vmatpush.msk.msrb.mxu2 %vm59_vm1, %v1583_v12  ;;  %v1249_v12 = vld.sshfl [vmem:[#allocation1 + $0x18] sm:$0xff pattern:$0x75316420] }
  0x83   :  { %1100 = vrot.lane.b32.xlu0 %v1092_v49, %s1526_s4  ;;  %1252 = vrot.lane.b32.xlu1 %v1246_v61, %s1528_s6 }
  0x84   :  { %v301_v62 = vpop.permute.xlu1 %300  ;;  %1104 = vrot.lane.b32.xlu2 %v1094_v54, %s1526_s4 }
  0x85   :  { %v41_v63 = vpop.permute.xlu0 %40 }
  0x86   :  { %v51_v1 = vsel %vm50_vm0, %v39_v58, %v41_v63  ;;  %v52_v2 = vsel %vm50_vm0, %v41_v63, %v43_v57  ;;  %v473_v3 = vpop.permute.xlu2 %472 }
  0x87   :  { %1407 = vmatpush.msk.msra.mxu0 %vm59_vm1, %v51_v1  ;;  %1409 = vmatpush.msk.msra.mxu1 %vm59_vm1, %v52_v2 }
  0x88   :  { %1408 = vmatmul.msk.f32.vlgmr.msra.gmra.mxu0 %vm56_vm2, %v23_v55  ;;  %1410 = vmatmul.msk.f32.vlgmr.msra.gmra.mxu1 %vm56_vm2, %v23_v55 }
  0x89   :  { %1420 = vmatmul.msk.f32.vlgmr.msrb.gmra.mxu2 %vm56_vm2, %v1554_v0  ;;  %1417 = vmatpush.msk.msrb.mxu1 %vm59_vm1, %v1581_v11  ;;  %v1251_v11 = vld.sshfl [vmem:[#allocation1 + $0x28] sm:$0xff pattern:$0x75316420] }
  0x8b   :  { %1425 = vmatpush.msk.msra.mxu1 %vm59_vm1, %v1590_v15  ;;  %1106 = vrot.lane.b32.xlu0 %v1095_v53, %s1526_s4 }
  0x8c   :  { %1256 = vrot.lane.b32.xlu1 %v1248_v4, %s1528_s6  ;;  %1254 = vrot.lane.b32.xlu2 %v1247_v5, %s1528_s6 }
  0x8d   :  { %v49_v6 = vpop.permute.xlu0 %48  ;;  %v317_v7 = vpop.permute.xlu1 %316 }
  0x8e   :  { %v329_v8 = vsel %vm328_vm3, %v317_v7, %v319_v56  ;;  %v55_v9 = vsel %vm50_vm0, %v47_v51, %v49_v6  ;;  %v477_v10 = vpop.permute.xlu2 %476 }
  0x8f   :  { %1415 = vmatpush.msk.msrb.mxu0 %vm59_vm1, %v55_v9  ;;  %1427 = vmatpush.msk.msra.mxu2 %vm59_vm1, %v329_v8 }
  0x90   :  { %1416 = vmatmul.msk.f32.vlgmr.msrb.gmra.mxu0 %vm56_vm2, %v23_v55  ;;  %1418 = vmatmul.msk.f32.vlgmr.msrb.gmra.mxu1 %vm56_vm2, %v1554_v0 }
  0x91   :  { %1428 = vmatmul.msk.f32.vlgmr.msra.gmra.mxu2 %vm56_vm2, %v301_v62  ;;  %1423 = vmatpush.msk.msra.mxu0 %vm59_vm1, %v1588_v14  ;;  %v1250_v14 = vld.sshfl [vmem:[#allocation1 + $0x20] sm:$0xff pattern:$0x75316420] }
  0x93   :  { %1236 = vrot.lane.b32.xlu0 %v1554_v0, %s1529_s7 }
  0x94   :  { %1262 = vrot.lane.b32.xlu1 %v1251_v11, %s1528_s6  ;;  %1258 = vrot.lane.b32.xlu2 %v1249_v12, %s1528_s6 }
  0x95   :  { %v321_v13 = vpop.permute.xlu0 %320  ;;  %v327_v15 = vpop.permute.xlu1 %326 }
  0x96   :  { %v330_v16 = vsel %vm328_vm3, %v319_v56, %v321_v13  ;;  %v331_v17 = vsel %vm328_vm3, %v321_v13, %v323_v60  ;;  %v483_v18 = vpop.permute.xlu2 %482 }
  0x97   :  { %1429 = vmatpush.msk.msra.mxu3 %vm59_vm1, %v330_v16  ;;  %1431 = vmatpush.msk.msrb.mxu0 %vm59_vm1, %v331_v17 }
  0x98   :  { %1424 = vmatmul.msk.f32.vlgmr.msra.gmra.mxu0 %vm56_vm2, %v1554_v0  ;;  %1426 = vmatmul.msk.f32.vlgmr.msra.gmra.mxu1 %vm56_vm2, %v1554_v0 }
  0x99   :  { %1430 = vmatmul.msk.f32.vlgmr.msra.gmra.mxu3 %vm56_vm2, %v301_v62 }
  0x9b   :  { %1260 = vrot.lane.b32.xlu0 %v1250_v14, %s1528_s6 }
  0x9d   :  { %v325_v19 = vpop.permute.xlu0 %324  ;;  %v457_v20 = vpop.permute.xlu1 %456 }
  0x9e   :  { %v332_v21 = vsel %vm328_vm3, %v323_v60, %v325_v19  ;;  %v333_v22 = vsel %vm328_vm3, %v325_v19, %v327_v15  ;;  %v613_v23 = vpop.permute.xlu2 %612 }
  0x9f   :  { %1433 = vmatpush.msk.msrb.mxu1 %vm59_vm1, %v332_v21  ;;  %1435 = vmatpush.msk.msrb.mxu2 %vm59_vm1, %v333_v22 }
  0xa0   :  { %1432 = vmatmul.msk.f32.vlgmr.msrb.gmra.mxu0 %vm56_vm2, %v301_v62  ;;  %1434 = vmatmul.msk.f32.vlgmr.msrb.gmra.mxu1 %vm56_vm2, %v301_v62 }
  0xa1   :  { %1436 = vmatmul.msk.f32.vlgmr.msrb.gmra.mxu2 %vm56_vm2, %v301_v62 }
  0xa5   :  { %v481_v0 = vpop.permute.xlu1 %480  ;;  %v475_v24 = vpop.permute.xlu0 %474 }
  0xa6   :  { %v485_v25 = vsel %vm484_vm4, %v473_v3, %v475_v24  ;;  %v486_v26 = vsel %vm484_vm4, %v475_v24, %v477_v10  ;;  %v489_v27 = vsel %vm484_vm4, %v481_v0, %v483_v18  ;;  %v637_v28 = vpop.permute.xlu2 %636 }
  0xa7   :  { %1437 = vmatpush.msk.msrb.mxu3 %vm59_vm1, %v485_v25  ;;  %1439 = vmatpush.msk.msra.mxu0 %vm59_vm1, %v486_v26  ;;  %v1387_v25 = vld [vmem:[%s1801_s2] sm:$0xff] }
  0xa8   :  { %1438 = vmatmul.msk.f32.vlgmr.msrb.gmra.mxu3 %vm56_vm2, %v457_v20  ;;  %1440 = vmatmul.msk.f32.vlgmr.msra.gmra.mxu0 %vm56_vm2, %v457_v20 }
  0xa9   :  { %1445 = vmatpush.msk.msra.mxu3 %vm59_vm1, %v489_v27 }
  0xad   :  { %v479_v29 = vpop.permute.xlu0 %478  ;;  %v631_v30 = vpop.permute.xlu1 %630 }
  0xae   :  { %v487_v31 = vsel %vm484_vm4, %v477_v10, %v479_v29  ;;  %v488_v32 = vsel %vm484_vm4, %v479_v29, %v481_v0  ;;  %v789_v33 = vpop.permute.xlu2 %788  ;;  %v1530_v0 = vmov 0  }
  0xaf   :  { %1441 = vmatpush.msk.msra.mxu1 %vm59_vm1, %v487_v31  ;;  %1443 = vmatpush.msk.msra.mxu2 %vm59_vm1, %v488_v32 }
  0xb0   :  { %1442 = vmatmul.msk.f32.vlgmr.msra.gmra.mxu1 %vm56_vm2, %v457_v20  ;;  %1444 = vmatmul.msk.f32.vlgmr.msra.gmra.mxu2 %vm56_vm2, %v457_v20 }
  0xb1   :  { %1446 = vmatmul.msk.f32.vlgmr.msra.gmra.mxu3 %vm56_vm2, %v457_v20  ;;  %1513 = vset.pattern.permute.xlu2 %v1530_v0 }
  0xb2   :  { %1514 = vset.pattern.permute.xlu0 %v1530_v0  ;;  %1390 = vperm.xlu2 %1513, %v1387_v25  }
  0xb5   :  { %v635_v34 = vpop.permute.xlu1 %634  ;;  %v629_v35 = vpop.permute.xlu0 %628 }
  0xb6   :  { %v644_v36 = vsel %vm640_vm5, %v635_v34, %v637_v28  ;;  %v641_v37 = vsel %vm640_vm5, %v629_v35, %v631_v30  ;;  %v785_v38 = vpop.permute.xlu2 %784 }
  0xb7   :  { %1447 = vmatpush.msk.msrb.mxu0 %vm59_vm1, %v641_v37  ;;  %1453 = vmatpush.msk.msrb.mxu3 %vm59_vm1, %v644_v36 }
  0xb8   :  { %1448 = vmatmul.msk.f32.vlgmr.msrb.gmra.mxu0 %vm56_vm2, %v613_v23 }
  0xb9   :  { %1454 = vmatmul.msk.f32.vlgmr.msrb.gmra.mxu3 %vm56_vm2, %v613_v23 }
  0xbd   :  { %v633_v39 = vpop.permute.xlu0 %632  ;;  %v787_v40 = vpop.permute.xlu1 %786 }
  0xbe   :  { %v642_v41 = vsel %vm640_vm5, %v631_v30, %v633_v39  ;;  %v643_v42 = vsel %vm640_vm5, %v633_v39, %v635_v34  ;;  %v798_v43 = vsel %vm796_vm6, %v787_v40, %v789_v33  ;;  %v797_v44 = vsel %vm796_vm6, %v785_v38, %v787_v40  ;;  %v943_v45 = vpop.permute.xlu2 %942 }
  0xbf   :  { %1449 = vmatpush.msk.msrb.mxu1 %vm59_vm1, %v642_v41  ;;  %1451 = vmatpush.msk.msrb.mxu2 %vm59_vm1, %v643_v42 }
  0xc0   :  { %1450 = vmatmul.msk.f32.vlgmr.msrb.gmra.mxu1 %vm56_vm2, %v613_v23  ;;  %1452 = vmatmul.msk.f32.vlgmr.msrb.gmra.mxu2 %vm56_vm2, %v613_v23 }
  0xc1   :  { %1457 = vmatpush.msk.msra.mxu1 %vm59_vm1, %v797_v44  ;;  %1459 = vmatpush.msk.msra.mxu2 %vm59_vm1, %v798_v43 }
  0xc5   :  { %v639_v46 = vpop.permute.xlu0 %638  ;;  %v769_v47 = vpop.permute.xlu1 %768 }
  0xc6   :  { %v645_v48 = vsel %vm640_vm5, %v637_v28, %v639_v46  ;;  %v795_v49 = vpop.permute.xlu2 %794 }
  0xc7   :  { %1455 = vmatpush.msk.msra.mxu0 %vm59_vm1, %v645_v48 }
  0xc8   :  { %1456 = vmatmul.msk.f32.vlgmr.msra.gmra.mxu0 %vm56_vm2, %v613_v23  ;;  %1458 = vmatmul.msk.f32.vlgmr.msra.gmra.mxu1 %vm56_vm2, %v769_v47 }
  0xc9   :  { %1460 = vmatmul.msk.f32.vlgmr.msra.gmra.mxu2 %vm56_vm2, %v769_v47 }
  0xcd   :  { %v791_v50 = vpop.permute.xlu0 %790  ;;  %v941_v51 = vpop.permute.xlu1 %940 }
  0xce   :  { %v799_v52 = vsel %vm796_vm6, %v789_v33, %v791_v50  ;;  %v953_v53 = vsel %vm952_vm7, %v941_v51, %v943_v45  ;;  %v951_v54 = vpop.permute.xlu2 %950 }
  0xcf   :  { %1461 = vmatpush.msk.msra.mxu3 %vm59_vm1, %v799_v52  ;;  %1467 = vmatpush.msk.msrb.mxu2 %vm59_vm1, %v953_v53 }
  0xd0   :  { %1462 = vmatmul.msk.f32.vlgmr.msra.gmra.mxu3 %vm56_vm2, %v769_v47 }
  0xd5   :  { %v793_v55 = vpop.permute.xlu0 %792  ;;  %v925_v56 = vpop.permute.xlu1 %924 }
  0xd6   :  { %v800_v57 = vsel %vm796_vm6, %v791_v50, %v793_v55  ;;  %v801_v58 = vsel %vm796_vm6, %v793_v55, %v795_v49  ;;  %1468 = vmatmul.msk.f32.vlgmr.msrb.gmra.mxu2 %vm56_vm2, %v925_v56  ;;  %v1081_v63 = vpop.permute.xlu2 %1080 }
  0xd7   :  { %1463 = vmatpush.msk.msrb.mxu0 %vm59_vm1, %v800_v57  ;;  %1465 = vmatpush.msk.msrb.mxu1 %vm59_vm1, %v801_v58 }
  0xd8   :  { %1464 = vmatmul.msk.f32.vlgmr.msrb.gmra.mxu0 %vm56_vm2, %v769_v47  ;;  %1466 = vmatmul.msk.f32.vlgmr.msrb.gmra.mxu1 %vm56_vm2, %v769_v47 }
  0xdd   :  { %v945_v59 = vpop.permute.xlu0 %944  ;;  %v949_v60 = vpop.permute.xlu1 %948 }
  0xde   :  { %v954_v61 = vsel %vm952_vm7, %v943_v45, %v945_v59  ;;  %v957_v62 = vsel %vm952_vm7, %v949_v60, %v951_v54  ;;  %v1105_v5 = vpop.permute.xlu2 %1104 }
  0xdf   :  { %1469 = vmatpush.msk.msrb.mxu3 %vm59_vm1, %v954_v61  ;;  %1475 = vmatpush.msk.msra.mxu2 %vm59_vm1, %v957_v62 }
  0xe0   :  { %1470 = vmatmul.msk.f32.vlgmr.msrb.gmra.mxu3 %vm56_vm2, %v925_v56  ;;  %1476 = vmatmul.msk.f32.vlgmr.msra.gmra.mxu2 %vm56_vm2, %v925_v56 }
  0xe5   :  { %v947_v1 = vpop.permute.xlu0 %946  ;;  %v1099_v2 = vpop.permute.xlu1 %1098 }
  0xe6   :  { %v955_v3 = vsel %vm952_vm7, %v945_v59, %v947_v1  ;;  %v956_v4 = vsel %vm952_vm7, %v947_v1, %v949_v60  ;;  %v1255_v10 = vpop.permute.xlu2 %1254 }
  0xe7   :  { %1471 = vmatpush.msk.msra.mxu0 %vm59_vm1, %v955_v3  ;;  %1473 = vmatpush.msk.msra.mxu1 %vm59_vm1, %v956_v4 }
  0xe8   :  { %1472 = vmatmul.msk.f32.vlgmr.msra.gmra.mxu0 %vm56_vm2, %v925_v56  ;;  %1474 = vmatmul.msk.f32.vlgmr.msra.gmra.mxu1 %vm56_vm2, %v925_v56 }
  0xed   :  { %v1103_v6 = vpop.permute.xlu1 %1102  ;;  %v1097_v7 = vpop.permute.xlu0 %1096 }
  0xee   :  { %v1112_v8 = vsel %vm1108_vm8, %v1103_v6, %v1105_v5  ;;  %v1109_v9 = vsel %vm1108_vm8, %v1097_v7, %v1099_v2  ;;  %v1259_v17 = vpop.permute.xlu2 %1258 }
  0xef   :  { %1477 = vmatpush.msk.msra.mxu3 %vm59_vm1, %v1109_v9  ;;  %1483 = vmatpush.msk.msrb.mxu2 %vm59_vm1, %v1112_v8 }
  0xf0   :  { %1478 = vmatmul.msk.f32.vlgmr.msra.gmra.mxu3 %vm56_vm2, %v1081_v63  ;;  %1484 = vmatmul.msk.f32.vlgmr.msrb.gmra.mxu2 %vm56_vm2, %v1081_v63 }
  0xf5   :  { %v1101_v11 = vpop.permute.xlu0 %1100  ;;  %v1253_v12 = vpop.permute.xlu1 %1252 }
  0xf6   :  { %v1110_v13 = vsel %vm1108_vm8, %v1099_v2, %v1101_v11  ;;  %v1111_v15 = vsel %vm1108_vm8, %v1101_v11, %v1103_v6  ;;  %v1265_v16 = vsel %vm1264_vm9, %v1253_v12, %v1255_v10 }
  0xf7   :  { %1479 = vmatpush.msk.msrb.mxu0 %vm59_vm1, %v1110_v13  ;;  %1481 = vmatpush.msk.msrb.mxu1 %vm59_vm1, %v1111_v15 }
  0xf8   :  { %1480 = vmatmul.msk.f32.vlgmr.msrb.gmra.mxu0 %vm56_vm2, %v1081_v63  ;;  %1482 = vmatmul.msk.f32.vlgmr.msrb.gmra.mxu1 %vm56_vm2, %v1081_v63  ;;  %v147_v30 = vpop.f32.mrf.mxu3 }
  0xf9   :  { %1487 = vmatpush.msk.msra.mxu0 %vm59_vm1, %v1265_v16 }
  0xfd   :  { %v1107_v18 = vpop.permute.xlu0 %1106 }
  0xfe   :  { %v1257_v14 = vpop.permute.xlu1 %1256  ;;  %v1113_v19 = vsel %vm1108_vm8, %v1105_v5, %v1107_v18 }
  0xff   :  { %v1266_v20 = vsel %vm1264_vm9, %v1255_v10, %v1257_v14  ;;  %v1267_v21 = vsel %vm1264_vm9, %v1257_v14, %v1259_v17  ;;  %1485 = vmatpush.msk.msrb.mxu3 %vm59_vm1, %v1113_v19 }
 0x100   :  { %1489 = vmatpush.msk.msra.mxu1 %vm59_vm1, %v1266_v20  ;;  %1486 = vmatmul.msk.f32.vlgmr.msrb.gmra.mxu3 %vm56_vm2, %v1081_v63  ;;  %v252_v38 = vpop.f32.mrf.mxu3 }
 0x101   :  { %1491 = vmatpush.msk.msra.mxu2 %vm59_vm1, %v1267_v21 }
 0x102   :  { %v127_v34 = vpop.f32.mrf.mxu2 }
 0x103   :  { %v253_v11 = vadd.f32 %v252_v38, %v127_v34 }
 0x105   :  { %v87_v22 = vpop.f32.mrf.mxu0  ;;  %v1237_v23 = vpop.permute.xlu0 %1236 }
 0x106   :  { %1488 = vmatmul.msk.f32.vlgmr.msra.gmra.mxu0 %vm56_vm2, %v1237_v23  ;;  %1490 = vmatmul.msk.f32.vlgmr.msra.gmra.mxu1 %vm56_vm2, %v1237_v23  ;;  %v1263_v24 = vpop.permute.xlu1 %1262  ;;  %v107_v33 = vpop.f32.mrf.mxu1 }
 0x107   :  { %1492 = vmatmul.msk.f32.vlgmr.msra.gmra.mxu2 %vm56_vm2, %v1237_v23 }
 0x10c   :  { %v232_v36 = vpop.f32.mrf.mxu2  ;;  %v1391_v0 = vpop.permute.xlu2 %1390 }
 0x10d   :  { %v167_v26 = vpop.f32.mrf.mxu0  ;;  %v1261_v27 = vpop.permute.xlu0 %1260  ;;  %v233_v62 = vadd.f32 %v232_v36, %v107_v33 }
 0x10e   :  { %v1268_v28 = vsel %vm1264_vm9, %v1259_v17, %v1261_v27  ;;  %v1269_v29 = vsel %vm1264_vm9, %v1261_v27, %v1263_v24  ;;  %v212_v35 = vpop.f32.mrf.mxu1 }
 0x10f   :  { %1493 = vmatpush.msk.msra.mxu3 %vm59_vm1, %v1268_v28  ;;  %1495 = vmatpush.msk.msrb.mxu0 %vm59_vm1, %v1269_v29  ;;  %v213_v63 = vadd.f32 %v212_v35, %v87_v22 }
 0x110   :  { %1494 = vmatmul.msk.f32.vlgmr.msra.gmra.mxu3 %vm56_vm2, %v1237_v23  ;;  %1496 = vmatmul.msk.f32.vlgmr.msrb.gmra.mxu0 %vm56_vm2, %v1237_v23 }
 0x114   :  { %v363_v39 = vpop.f32.mrf.mxu2 }
 0x115   :  { %v272_v31 = vpop.f32.mrf.mxu0  ;;  %v446_v2 = vadd.f32 %v363_v39, %v213_v63 }
 0x116   :  { %v1781_v32 = vadd.f32 %v272_v31, %v147_v30  ;;  %v292_v37 = vpop.f32.mrf.mxu1 }
 0x117   :  { %v293_v17 = vadd.f32 %v292_v37, %v167_v26 }
 0x11c   :  { %v383_v42 = vpop.f32.mrf.mxu3 }
 0x11d   :  { %v403_v40 = vpop.f32.mrf.mxu0  ;;  %v447_v3 = vadd.f32 %v383_v42, %v233_v62 }
 0x11e   :  { %v423_v41 = vpop.f32.mrf.mxu1  ;;  %v448_v15 = vadd.f32 %v403_v40, %v253_v11 }
 0x11f   :  { %v449_v26 = vadd.f32 %v423_v41, %v1781_v32 }
 0x124   :  { %v443_v43 = vpop.f32.mrf.mxu2 }
 0x125   :  { %v539_v45 = vpop.f32.mrf.mxu0  ;;  %v450_v20 = vadd.f32 %v443_v43, %v293_v17 }
 0x126   :  { %v603_v4 = vadd.f32 %v539_v45, %v447_v3 }
 0x12b   :  { %v519_v46 = vpop.f32.mrf.mxu3 }
 0x12c   :  { %v602_v5 = vadd.f32 %v519_v46, %v446_v2 }
 0x12d   :  { %v559_v44 = vpop.f32.mrf.mxu1 }
 0x12e   :  { %v604_v19 = vadd.f32 %v559_v44, %v448_v15 }
 0x133   :  { %v579_v47 = vpop.f32.mrf.mxu2 }
 0x134   :  { %v599_v50 = vpop.f32.mrf.mxu3  ;;  %v605_v40 = vadd.f32 %v579_v47, %v449_v26 }
 0x135   :  { %v675_v49 = vpop.f32.mrf.mxu0  ;;  %v606_v28 = vadd.f32 %v599_v50, %v450_v20 }
 0x136   :  { %v758_v9 = vadd.f32 %v675_v49, %v602_v5 }
 0x13c   :  { %v735_v54 = vpop.f32.mrf.mxu3 }
 0x13d   :  { %v695_v48 = vpop.f32.mrf.mxu1  ;;  %v761_v45 = vadd.f32 %v735_v54, %v605_v40 }
 0x13e   :  { %v759_v10 = vadd.f32 %v695_v48, %v603_v4 }
 0x143   :  { %v715_v51 = vpop.f32.mrf.mxu2 }
 0x144   :  { %v760_v24 = vadd.f32 %v715_v51, %v604_v19 }
 0x145   :  { %v755_v52 = vpop.f32.mrf.mxu0  ;;  %v831_v53 = vpop.f32.mrf.mxu1 }
 0x146   :  { %v914_v12 = vadd.f32 %v831_v53, %v758_v9  ;;  %v762_v33 = vadd.f32 %v755_v52, %v606_v28 }
 0x14c   :  { %v851_v55 = vpop.f32.mrf.mxu2 }
 0x14d   :  { %v915_v13 = vadd.f32 %v851_v55, %v759_v10 }
 0x153   :  { %v871_v58 = vpop.f32.mrf.mxu3 }
 0x154   :  { %v916_v31 = vadd.f32 %v871_v58, %v760_v24 }
 0x155   :  { %v891_v56 = vpop.f32.mrf.mxu0  ;;  %v911_v57 = vpop.f32.mrf.mxu1 }
 0x156   :  { %v918_v37 = vadd.f32 %v911_v57, %v762_v33  ;;  %v917_v32 = vadd.f32 %v891_v56, %v761_v45 }
 0x159   :  { %v987_v59 = vpop.f32.mrf.mxu2 }
 0x15a   :  { %v1070_v18 = vadd.f32 %v987_v59, %v914_v12 }
 0x163   :  { %v1007_v1 = vpop.f32.mrf.mxu3  ;;  %v1067_v6 = vpop.f32.mrf.mxu2 }
 0x164   :  { %v1071_v14 = vadd.f32 %v1007_v1, %v915_v13  ;;  %v1074_v42 = vadd.f32 %v1067_v6, %v918_v37 }
 0x165   :  { %v1027_v60 = vpop.f32.mrf.mxu0  ;;  %v1047_v61 = vpop.f32.mrf.mxu1 }
 0x166   :  { %v1072_v36 = vadd.f32 %v1027_v60, %v916_v31  ;;  %v1073_v50 = vadd.f32 %v1047_v61, %v917_v32 }
 0x173   :  { %v1143_v16 = vpop.f32.mrf.mxu3  ;;  %v1203_v22 = vpop.f32.mrf.mxu2 }
 0x174   :  { %v1226_v21 = vadd.f32 %v1143_v16, %v1070_v18  ;;  %v1229_v52 = vadd.f32 %v1203_v22, %v1073_v50 }
 0x175   :  { %v1163_v7 = vpop.f32.mrf.mxu0  ;;  %v1183_v8 = vpop.f32.mrf.mxu1 }
 0x176   :  { %v1227_v23 = vadd.f32 %v1163_v7, %v1071_v14  ;;  %v1228_v38 = vadd.f32 %v1183_v8, %v1072_v36 }
 0x183   :  { %v1299_v25 = vpop.f32.mrf.mxu0  ;;  %v1319_v27 = vpop.f32.mrf.mxu1 }
 0x184   :  { %v1382_v29 = vadd.f32 %v1299_v25, %v1226_v21  ;;  %v1383_v30 = vadd.f32 %v1319_v27, %v1227_v23  ;;  %v1223_v39 = vpop.f32.mrf.mxu3 }
 0x185   :  { %v1230_v46 = vadd.f32 %v1223_v39, %v1074_v42 }
 0x186   :  { %v1393_v34 = vadd.f32 %v1391_v0, %v1382_v29  ;;  %v1394_v35 = vadd.f32 %v1391_v0, %v1383_v30 }
 0x188   :  { %1398 = vst [vmem:[%s1802_s3] sm:$0xff] %v1393_v34 }
 0x189   :  { %1399 = vst [vmem:[%s1802_s3 + $0x8] sm:$0xff] %v1394_v35 }
 0x18a   :  { %v1339_v43 = vpop.f32.mrf.mxu2 }
 0x18b   :  { %v1384_v44 = vadd.f32 %v1339_v43, %v1228_v38 }
 0x18d   :  { %v1395_v48 = vadd.f32 %v1391_v0, %v1384_v44  ;;  %v1379_v49 = vpop.f32.mrf.mxu0 }
 0x18e   :  { %v1386_v41 = vadd.f32 %v1379_v49, %v1230_v46 }
 0x18f   :  { %1400 = vst [vmem:[%s1802_s3 + $0x10] sm:$0xff] %v1395_v48 }
 0x190   :  { %v1397_v51 = vadd.f32 %v1391_v0, %v1386_v41 }
 0x192   :  { %1402 = vst [vmem:[%s1802_s3 + $0x20] sm:$0xff] %v1397_v51 }
 0x193   :  { %v1359_v47 = vpop.f32.mrf.mxu3 }
 0x194   :  { %v1385_v53 = vadd.f32 %v1359_v47, %v1229_v52 }
 0x196   :  { %v1396_v55 = vadd.f32 %v1391_v0, %v1385_v53 }
 0x198   :  { %1401 = vst [vmem:[%s1802_s3 + $0x18] sm:$0xff] %v1396_v55 }

</bundles_post_ra>
